<compile_context>
chip_gen: v7x
topology: tpu7x:2x2x1
jax: 0.10.0
libtpu: 0.0.40
codegen_flags: <defaults>
</compile_context>

<pallas_src>
import jax
import jax.numpy as jnp
import numpy as np
from jax.experimental import pallas as pl
from jax.experimental.pallas import tpu as pltpu

# ---------------- static configuration (matches ResidualStack.__init__) -------
DIM = 8                               # channels (dim)
T_LEN = 128                           # sequence length
BATCH = 2
KERNEL_SIZES = (3, 5)                 # one ResidualBlock per kernel size
DILATIONS_LIST = ((1, 3), (1, 3))     # dilations_list (shared by all blocks)


def _make_kernel(dim, t_len, batch, blocks_cfg, kc_pad):
    """blocks_cfg: tuple of (kernel_size, dilations_list) per ResidualBlock."""
    bt = batch * t_len

    def kernel(x_ref, w_ref, o_ref):
        # x_ref: (C, B*T) activations (batch lane-concatenated);
        # w_ref: (n_total_convs, C, kc_pad) fused weight|bias|pad matrices;
        # o_ref: (C, B*T).
        # Hoisted constants: traced once, reused by every conv.
        lane_mod = jax.lax.broadcasted_iota(jnp.int32, (dim, bt), 1) % t_len
        ones_row = jnp.ones((1, bt), jnp.float32)

        def shifted_tap(y, s):
            # z[:, t] = y[:, t + s] within the same batch segment, zero in the
            # conv halo / across batch boundaries ((lane % T)-based mask).
            if s == 0:
                return y
            z = pltpu.roll(y, (-s) % bt, axis=1)          # XLU lane rotate
            if s < 0:
                return jnp.where(lane_mod >= -s, z, 0.0)
            return jnp.where(lane_mod < t_len - s, z, 0.0)

        x = x_ref[...].astype(jnp.float32)                # (C, B*T)
        acc = jnp.zeros_like(x)                           # stack-sum accumulator
        ci = 0
        for ksize, dilations_list in blocks_cfg:          # ResidualBlock
            n_zero = kc_pad - ksize * dim - 1
            zero_rows = (jnp.zeros((n_zero, bt), jnp.float32)
                         if n_zero > 0 else None)
            xb = x
            for dilations in dilations_list:              # ResidualLayer
                y = xb
                for d in dilations:                       # LeakyReLU -> conv
                    y = jnp.maximum(y, 0.2 * y)           # LeakyReLU(0.2)
                    pad_l = ((ksize - 1) * d) // 2        # centered "same" pad
                    taps = [shifted_tap(y, k * d - pad_l) for k in range(ksize)]
                    pieces = taps + [ones_row]
                    if zero_rows is not None:
                        pieces.append(zero_rows)
                    rhs = jnp.concatenate(pieces, axis=0)  # (kc_pad, B*T)
                    # Fused K-tap dilated conv + bias: one MXU matmul.
                    y = jnp.dot(w_ref[ci], rhs,
                                preferred_element_type=jnp.float32)
                    ci += 1
                xb = xb + y                               # residual add
            acc = acc + xb                                # ResidualStack sum
        o_ref[...] = acc.astype(o_ref.dtype)

    return kernel


def _fuse_weights(blocks_params, blocks_cfg, c, kc_pad):
    """Flatten per-conv (C_out, C_in, K) weights + bias into (n, C, kc_pad)."""
    parts = []
    for (ksize, _), (weights, biases) in zip(blocks_cfg, blocks_params):
        n_conv = weights.shape[0]
        # row index = k*C + cin, matching the tap stacking order in the kernel.
        w_f = jnp.transpose(weights, (0, 1, 3, 2)).reshape(n_conv, c, ksize * c)
        pad = kc_pad - ksize * c - 1
        parts.append(jnp.concatenate(
            [w_f.astype(jnp.float32),
             biases.astype(jnp.float32)[:, :, None],
             jnp.zeros((n_conv, c, pad), jnp.float32)],
            axis=-1))
    return jnp.concatenate(parts, axis=0)                 # (n_total, C, kc_pad)


def residual_stack_pallas(x, blocks_params, *, blocks_cfg):
    """x: (B, C, T); blocks_params: [(weights_b, biases_b)] with
    weights_b: (n_conv_b, C, C, K_b), biases_b: (n_conv_b, C)."""
    b, c, t = x.shape
    bt = b * t

    max_k = max(k for k, _ in blocks_cfg)
    kc = max_k * c + 1                       # K*C_in tap rows + 1 bias row
    kc_pad = -(-kc // 8) * 8                 # round contraction up to sublanes

    w_aug = _fuse_weights(blocks_params, blocks_cfg, c, kc_pad)
    n_total = w_aug.shape[0]

    # Batch lane-concatenation: (B, C, T) -> (C, B*T). 8 KiB transpose in the
    # wrapper; the kernel sees one lane-dense slab.
    x_slab = jnp.transpose(x, (1, 0, 2)).reshape(c, bt)

    kernel = _make_kernel(c, t, b, blocks_cfg, kc_pad)

    flops = int(n_total) * 2 * c * kc_pad * bt            # fused conv matmuls
    bytes_accessed = (x_slab.size + bt * c + w_aug.size) * 4

    out_slab = pl.pallas_call(
        kernel,
        out_shape=jax.ShapeDtypeStruct((c, bt), x.dtype),
        grid_spec=pltpu.PrefetchScalarGridSpec(
            num_scalar_prefetch=0,
            grid=(1,),
            in_specs=[
                pl.BlockSpec((c, bt), lambda i: (0, 0)),
                pl.BlockSpec((n_total, c, kc_pad), lambda i: (0, 0, 0)),
            ],
            out_specs=pl.BlockSpec((c, bt), lambda i: (0, 0)),
        ),
        compiler_params=pltpu.CompilerParams(
            dimension_semantics=("arbitrary",)),
        cost_estimate=pl.CostEstimate(
            flops=flops, transcendentals=0, bytes_accessed=bytes_accessed),
    )(x_slab, w_aug)

    return jnp.transpose(out_slab.reshape(c, b, t), (1, 0, 2))


def residual_stack_ref(x, blocks_params, *, blocks_cfg):
    """Pure-JAX reference mirroring the PyTorch forward (NCW conv1d)."""
    total = None
    for (ksize, dilations_list), (weights, biases) in zip(blocks_cfg,
                                                          blocks_params):
        ci = 0
        xb = x
        for dilations in dilations_list:
            y = xb
            for d in dilations:
                y = jnp.where(y > 0, y, 0.2 * y)
                full = (ksize - 1) * d
                pad_l, pad_r = full // 2, full - full // 2
                y = jax.lax.conv_general_dilated(
                    y, weights[ci],
                    window_strides=(1,),
                    padding=[(pad_l, pad_r)],
                    rhs_dilation=(d,),
                    dimension_numbers=('NCH', 'OIH', 'NCH'),
                ) + biases[ci][None, :, None]
                ci += 1
            xb = xb + y
        total = xb if total is None else total + xb
    return total


if __name__ == "__main__":
    key = jax.random.PRNGKey(0)
    blocks_cfg = tuple((k, DILATIONS_LIST) for k in KERNEL_SIZES)
    n_conv_per_block = sum(len(dl) for dl in DILATIONS_LIST)

    k_x, *k_blocks = jax.random.split(key, 1 + 2 * len(KERNEL_SIZES))
    x = jax.random.normal(k_x, (BATCH, DIM, T_LEN), dtype=jnp.float32)

    blocks_params = []
    for bi, ksize in enumerate(KERNEL_SIZES):
        fan_in = DIM * ksize
        w = jax.random.normal(
            k_blocks[2 * bi], (n_conv_per_block, DIM, DIM, ksize),
            dtype=jnp.float32) / np.sqrt(fan_in)
        bb = 0.01 * jax.random.normal(
            k_blocks[2 * bi + 1], (n_conv_per_block, DIM), dtype=jnp.float32)
        blocks_params.append((w, bb))

    out = residual_stack_pallas(x, blocks_params, blocks_cfg=blocks_cfg)
    out = jax.block_until_ready(out)

    ref = residual_stack_ref(x, blocks_params, blocks_cfg=blocks_cfg)
    np.testing.assert_allclose(np.asarray(out), np.asarray(ref),
                               rtol=1e-4, atol=1e-4)

    print("KERNEL_OK")
</pallas_src>

<mosaic_0001>
module attributes {stable_mosaic.version = 11 : i64} {
  func.func @kernel(%arg0: i32, %arg1: memref<8x256xf32, #tpu.memory_space<vmem>>, %arg2: memref<8x8x48xf32, #tpu.memory_space<vmem>>, %arg3: memref<8x256xf32, #tpu.memory_space<vmem>>) attributes {dimension_semantics = [#tpu.dimension_semantics<arbitrary>], iteration_bounds = array<i64: 1>, scalar_prefetch = 0 : i64, scratch_operands = 0 : i64, tpu.core_type = #tpu.core_type<tc>, window_params = [{pipeline_mode = #tpu.pipeline_mode<synchronous>, transform_indices = @transform_0, window_bounds = array<i64: 8, 256>}, {pipeline_mode = #tpu.pipeline_mode<synchronous>, transform_indices = @transform_1, window_bounds = array<i64: 8, 8, 48>}, {pipeline_mode = #tpu.pipeline_mode<synchronous>, transform_indices = @transform_2, window_bounds = array<i64: 8, 256>}]} {
    %0 = tpu.iota {dimensions = array<i32: 1>} : vector<8x256xi32>
    %c128_i32 = arith.constant 128 : i32
    %c0_i32 = arith.constant 0 : i32
    %1 = arith.cmpi eq, %c128_i32, %c0_i32 : i32
    %c1_i32 = arith.constant 1 : i32
    %2 = arith.select %1, %c1_i32, %c128_i32 : i32
    %3 = vector.broadcast %2 : i32 to vector<8x256xi32>
    %4 = arith.remsi %0, %3 : vector<8x256xi32>
    %c0_i32_0 = arith.constant 0 : i32
    %5 = vector.broadcast %c0_i32_0 : i32 to vector<8x256xi32>
    %6 = arith.cmpi ne, %4, %5 : vector<8x256xi32>
    %c0_i32_1 = arith.constant 0 : i32
    %7 = vector.broadcast %c0_i32_1 : i32 to vector<8x256xi32>
    %8 = arith.cmpi slt, %4, %7 : vector<8x256xi32>
    %c0_i32_2 = arith.constant 0 : i32
    %9 = arith.cmpi slt, %2, %c0_i32_2 : i32
    %10 = vector.broadcast %9 : i1 to vector<8x256xi1>
    %11 = vector.broadcast %10 : vector<8x256xi1> to vector<8x256xi1>
    %12 = arith.xori %8, %11 : vector<8x256xi1>
    %13 = arith.andi %12, %6 : vector<8x256xi1>
    %14 = vector.broadcast %2 : i32 to vector<8x256xi32>
    %15 = arith.addi %4, %14 : vector<8x256xi32>
    %16 = arith.select %13, %15, %4 : vector<8x256xi1>, vector<8x256xi32>
    %cst = arith.constant 1.000000e+00 : f32
    %17 = vector.broadcast %cst : f32 to vector<1x256xf32>
    %c0 = arith.constant 0 : index
    %c0_3 = arith.constant 0 : index
    %18 = vector.load %arg1[%c0, %c0_3] : memref<8x256xf32, #tpu.memory_space<vmem>>, vector<8x256xf32>
    %cst_4 = arith.constant 0.000000e+00 : f32
    %19 = vector.broadcast %cst_4 : f32 to vector<8x256xf32>
    %cst_5 = arith.constant 0.000000e+00 : f32
    %20 = vector.broadcast %cst_5 : f32 to vector<23x256xf32>
    %cst_6 = arith.constant 2.000000e-01 : f32
    %21 = vector.broadcast %cst_6 : f32 to vector<8x256xf32>
    %22 = arith.mulf %21, %18 : vector<8x256xf32>
    %23 = arith.maximumf %18, %22 : vector<8x256xf32>
    %c1_i32_7 = arith.constant 1 : i32
    %24 = tpu.dynamic_rotate %23 by %c1_i32_7 dim 1 : vector<8x256xf32>, i32 -> vector<8x256xf32>
    %c1_i32_8 = arith.constant 1 : i32
    %25 = vector.broadcast %c1_i32_8 : i32 to vector<8x256xi32>
    %26 = arith.cmpi sge, %16, %25 : vector<8x256xi32>
    %cst_9 = arith.constant 0.000000e+00 : f32
    %27 = vector.broadcast %cst_9 : f32 to vector<8x256xf32>
    %28 = arith.select %26, %24, %27 : vector<8x256xi1>, vector<8x256xf32>
    %c255_i32 = arith.constant 255 : i32
    %29 = tpu.dynamic_rotate %23 by %c255_i32 dim 1 : vector<8x256xf32>, i32 -> vector<8x256xf32>
    %c127_i32 = arith.constant 127 : i32
    %30 = vector.broadcast %c127_i32 : i32 to vector<8x256xi32>
    %31 = arith.cmpi slt, %16, %30 : vector<8x256xi32>
    %cst_10 = arith.constant 0.000000e+00 : f32
    %32 = vector.broadcast %cst_10 : f32 to vector<8x256xf32>
    %33 = arith.select %31, %29, %32 : vector<8x256xi1>, vector<8x256xf32>
    %34 = tpu.concatenate %28, %23, %33, %17, %20 in 0 : vector<8x256xf32>, vector<8x256xf32>, vector<8x256xf32>, vector<1x256xf32>, vector<23x256xf32> -> vector<48x256xf32>
    %c0_11 = arith.constant 0 : index
    %c0_12 = arith.constant 0 : index
    %c0_13 = arith.constant 0 : index
    %35 = vector.load %arg2[%c0_11, %c0_12, %c0_13] : memref<8x8x48xf32, #tpu.memory_space<vmem>>, vector<1x8x48xf32>
    %36 = vector.shape_cast %35 : vector<1x8x48xf32> to vector<8x48xf32>
    %cst_14 = arith.constant dense<0.000000e+00> : vector<8x256xf32>
    %37 = tpu.matmul %36, %34, %cst_14 {dimension_numbers = #tpu.dot_dimension_numbers<[1], [0], [0], [1], [0, 0, 1, 1], [], []>} : vector<8x48xf32>, vector<48x256xf32>, vector<8x256xf32> -> vector<8x256xf32>
    %cst_15 = arith.constant 2.000000e-01 : f32
    %38 = vector.broadcast %cst_15 : f32 to vector<8x256xf32>
    %39 = arith.mulf %38, %37 : vector<8x256xf32>
    %40 = arith.maximumf %37, %39 : vector<8x256xf32>
    %c3_i32 = arith.constant 3 : i32
    %41 = tpu.dynamic_rotate %40 by %c3_i32 dim 1 : vector<8x256xf32>, i32 -> vector<8x256xf32>
    %c3_i32_16 = arith.constant 3 : i32
    %42 = vector.broadcast %c3_i32_16 : i32 to vector<8x256xi32>
    %43 = arith.cmpi sge, %16, %42 : vector<8x256xi32>
    %cst_17 = arith.constant 0.000000e+00 : f32
    %44 = vector.broadcast %cst_17 : f32 to vector<8x256xf32>
    %45 = arith.select %43, %41, %44 : vector<8x256xi1>, vector<8x256xf32>
    %c253_i32 = arith.constant 253 : i32
    %46 = tpu.dynamic_rotate %40 by %c253_i32 dim 1 : vector<8x256xf32>, i32 -> vector<8x256xf32>
    %c125_i32 = arith.constant 125 : i32
    %47 = vector.broadcast %c125_i32 : i32 to vector<8x256xi32>
    %48 = arith.cmpi slt, %16, %47 : vector<8x256xi32>
    %cst_18 = arith.constant 0.000000e+00 : f32
    %49 = vector.broadcast %cst_18 : f32 to vector<8x256xf32>
    %50 = arith.select %48, %46, %49 : vector<8x256xi1>, vector<8x256xf32>
    %51 = tpu.concatenate %45, %40, %50, %17, %20 in 0 : vector<8x256xf32>, vector<8x256xf32>, vector<8x256xf32>, vector<1x256xf32>, vector<23x256xf32> -> vector<48x256xf32>
    %c1 = arith.constant 1 : index
    %c0_19 = arith.constant 0 : index
    %c0_20 = arith.constant 0 : index
    %52 = vector.load %arg2[%c1, %c0_19, %c0_20] : memref<8x8x48xf32, #tpu.memory_space<vmem>>, vector<1x8x48xf32>
    %53 = vector.shape_cast %52 : vector<1x8x48xf32> to vector<8x48xf32>
    %cst_21 = arith.constant dense<0.000000e+00> : vector<8x256xf32>
    %54 = tpu.matmul %53, %51, %cst_21 {dimension_numbers = #tpu.dot_dimension_numbers<[1], [0], [0], [1], [0, 0, 1, 1], [], []>} : vector<8x48xf32>, vector<48x256xf32>, vector<8x256xf32> -> vector<8x256xf32>
    %55 = arith.addf %18, %54 : vector<8x256xf32>
    %cst_22 = arith.constant 2.000000e-01 : f32
    %56 = vector.broadcast %cst_22 : f32 to vector<8x256xf32>
    %57 = arith.mulf %56, %55 : vector<8x256xf32>
    %58 = arith.maximumf %55, %57 : vector<8x256xf32>
    %c1_i32_23 = arith.constant 1 : i32
    %59 = tpu.dynamic_rotate %58 by %c1_i32_23 dim 1 : vector<8x256xf32>, i32 -> vector<8x256xf32>
    %c1_i32_24 = arith.constant 1 : i32
    %60 = vector.broadcast %c1_i32_24 : i32 to vector<8x256xi32>
    %61 = arith.cmpi sge, %16, %60 : vector<8x256xi32>
    %cst_25 = arith.constant 0.000000e+00 : f32
    %62 = vector.broadcast %cst_25 : f32 to vector<8x256xf32>
    %63 = arith.select %61, %59, %62 : vector<8x256xi1>, vector<8x256xf32>
    %c255_i32_26 = arith.constant 255 : i32
    %64 = tpu.dynamic_rotate %58 by %c255_i32_26 dim 1 : vector<8x256xf32>, i32 -> vector<8x256xf32>
    %c127_i32_27 = arith.constant 127 : i32
    %65 = vector.broadcast %c127_i32_27 : i32 to vector<8x256xi32>
    %66 = arith.cmpi slt, %16, %65 : vector<8x256xi32>
    %cst_28 = arith.constant 0.000000e+00 : f32
    %67 = vector.broadcast %cst_28 : f32 to vector<8x256xf32>
    %68 = arith.select %66, %64, %67 : vector<8x256xi1>, vector<8x256xf32>
    %69 = tpu.concatenate %63, %58, %68, %17, %20 in 0 : vector<8x256xf32>, vector<8x256xf32>, vector<8x256xf32>, vector<1x256xf32>, vector<23x256xf32> -> vector<48x256xf32>
    %c2 = arith.constant 2 : index
    %c0_29 = arith.constant 0 : index
    %c0_30 = arith.constant 0 : index
    %70 = vector.load %arg2[%c2, %c0_29, %c0_30] : memref<8x8x48xf32, #tpu.memory_space<vmem>>, vector<1x8x48xf32>
    %71 = vector.shape_cast %70 : vector<1x8x48xf32> to vector<8x48xf32>
    %cst_31 = arith.constant dense<0.000000e+00> : vector<8x256xf32>
    %72 = tpu.matmul %71, %69, %cst_31 {dimension_numbers = #tpu.dot_dimension_numbers<[1], [0], [0], [1], [0, 0, 1, 1], [], []>} : vector<8x48xf32>, vector<48x256xf32>, vector<8x256xf32> -> vector<8x256xf32>
    %cst_32 = arith.constant 2.000000e-01 : f32
    %73 = vector.broadcast %cst_32 : f32 to vector<8x256xf32>
    %74 = arith.mulf %73, %72 : vector<8x256xf32>
    %75 = arith.maximumf %72, %74 : vector<8x256xf32>
    %c3_i32_33 = arith.constant 3 : i32
    %76 = tpu.dynamic_rotate %75 by %c3_i32_33 dim 1 : vector<8x256xf32>, i32 -> vector<8x256xf32>
    %c3_i32_34 = arith.constant 3 : i32
    %77 = vector.broadcast %c3_i32_34 : i32 to vector<8x256xi32>
    %78 = arith.cmpi sge, %16, %77 : vector<8x256xi32>
    %cst_35 = arith.constant 0.000000e+00 : f32
    %79 = vector.broadcast %cst_35 : f32 to vector<8x256xf32>
    %80 = arith.select %78, %76, %79 : vector<8x256xi1>, vector<8x256xf32>
    %c253_i32_36 = arith.constant 253 : i32
    %81 = tpu.dynamic_rotate %75 by %c253_i32_36 dim 1 : vector<8x256xf32>, i32 -> vector<8x256xf32>
    %c125_i32_37 = arith.constant 125 : i32
    %82 = vector.broadcast %c125_i32_37 : i32 to vector<8x256xi32>
    %83 = arith.cmpi slt, %16, %82 : vector<8x256xi32>
    %cst_38 = arith.constant 0.000000e+00 : f32
    %84 = vector.broadcast %cst_38 : f32 to vector<8x256xf32>
    %85 = arith.select %83, %81, %84 : vector<8x256xi1>, vector<8x256xf32>
    %86 = tpu.concatenate %80, %75, %85, %17, %20 in 0 : vector<8x256xf32>, vector<8x256xf32>, vector<8x256xf32>, vector<1x256xf32>, vector<23x256xf32> -> vector<48x256xf32>
    %c3 = arith.constant 3 : index
    %c0_39 = arith.constant 0 : index
    %c0_40 = arith.constant 0 : index
    %87 = vector.load %arg2[%c3, %c0_39, %c0_40] : memref<8x8x48xf32, #tpu.memory_space<vmem>>, vector<1x8x48xf32>
    %88 = vector.shape_cast %87 : vector<1x8x48xf32> to vector<8x48xf32>
    %cst_41 = arith.constant dense<0.000000e+00> : vector<8x256xf32>
    %89 = tpu.matmul %88, %86, %cst_41 {dimension_numbers = #tpu.dot_dimension_numbers<[1], [0], [0], [1], [0, 0, 1, 1], [], []>} : vector<8x48xf32>, vector<48x256xf32>, vector<8x256xf32> -> vector<8x256xf32>
    %90 = arith.addf %55, %89 : vector<8x256xf32>
    %91 = arith.addf %19, %90 : vector<8x256xf32>
    %cst_42 = arith.constant 0.000000e+00 : f32
    %92 = vector.broadcast %cst_42 : f32 to vector<7x256xf32>
    %cst_43 = arith.constant 2.000000e-01 : f32
    %93 = vector.broadcast %cst_43 : f32 to vector<8x256xf32>
    %94 = arith.mulf %93, %18 : vector<8x256xf32>
    %95 = arith.maximumf %18, %94 : vector<8x256xf32>
    %c2_i32 = arith.constant 2 : i32
    %96 = tpu.dynamic_rotate %95 by %c2_i32 dim 1 : vector<8x256xf32>, i32 -> vector<8x256xf32>
    %c2_i32_44 = arith.constant 2 : i32
    %97 = vector.broadcast %c2_i32_44 : i32 to vector<8x256xi32>
    %98 = arith.cmpi sge, %16, %97 : vector<8x256xi32>
    %cst_45 = arith.constant 0.000000e+00 : f32
    %99 = vector.broadcast %cst_45 : f32 to vector<8x256xf32>
    %100 = arith.select %98, %96, %99 : vector<8x256xi1>, vector<8x256xf32>
    %c1_i32_46 = arith.constant 1 : i32
    %101 = tpu.dynamic_rotate %95 by %c1_i32_46 dim 1 : vector<8x256xf32>, i32 -> vector<8x256xf32>
    %c1_i32_47 = arith.constant 1 : i32
    %102 = vector.broadcast %c1_i32_47 : i32 to vector<8x256xi32>
    %103 = arith.cmpi sge, %16, %102 : vector<8x256xi32>
    %cst_48 = arith.constant 0.000000e+00 : f32
    %104 = vector.broadcast %cst_48 : f32 to vector<8x256xf32>
    %105 = arith.select %103, %101, %104 : vector<8x256xi1>, vector<8x256xf32>
    %c255_i32_49 = arith.constant 255 : i32
    %106 = tpu.dynamic_rotate %95 by %c255_i32_49 dim 1 : vector<8x256xf32>, i32 -> vector<8x256xf32>
    %c127_i32_50 = arith.constant 127 : i32
    %107 = vector.broadcast %c127_i32_50 : i32 to vector<8x256xi32>
    %108 = arith.cmpi slt, %16, %107 : vector<8x256xi32>
    %cst_51 = arith.constant 0.000000e+00 : f32
    %109 = vector.broadcast %cst_51 : f32 to vector<8x256xf32>
    %110 = arith.select %108, %106, %109 : vector<8x256xi1>, vector<8x256xf32>
    %c254_i32 = arith.constant 254 : i32
    %111 = tpu.dynamic_rotate %95 by %c254_i32 dim 1 : vector<8x256xf32>, i32 -> vector<8x256xf32>
    %c126_i32 = arith.constant 126 : i32
    %112 = vector.broadcast %c126_i32 : i32 to vector<8x256xi32>
    %113 = arith.cmpi slt, %16, %112 : vector<8x256xi32>
    %cst_52 = arith.constant 0.000000e+00 : f32
    %114 = vector.broadcast %cst_52 : f32 to vector<8x256xf32>
    %115 = arith.select %113, %111, %114 : vector<8x256xi1>, vector<8x256xf32>
    %116 = tpu.concatenate %100, %105, %95, %110, %115, %17, %92 in 0 : vector<8x256xf32>, vector<8x256xf32>, vector<8x256xf32>, vector<8x256xf32>, vector<8x256xf32>, vector<1x256xf32>, vector<7x256xf32> -> vector<48x256xf32>
    %c4 = arith.constant 4 : index
    %c0_53 = arith.constant 0 : index
    %c0_54 = arith.constant 0 : index
    %117 = vector.load %arg2[%c4, %c0_53, %c0_54] : memref<8x8x48xf32, #tpu.memory_space<vmem>>, vector<1x8x48xf32>
    %118 = vector.shape_cast %117 : vector<1x8x48xf32> to vector<8x48xf32>
    %cst_55 = arith.constant dense<0.000000e+00> : vector<8x256xf32>
    %119 = tpu.matmul %118, %116, %cst_55 {dimension_numbers = #tpu.dot_dimension_numbers<[1], [0], [0], [1], [0, 0, 1, 1], [], []>} : vector<8x48xf32>, vector<48x256xf32>, vector<8x256xf32> -> vector<8x256xf32>
    %cst_56 = arith.constant 2.000000e-01 : f32
    %120 = vector.broadcast %cst_56 : f32 to vector<8x256xf32>
    %121 = arith.mulf %120, %119 : vector<8x256xf32>
    %122 = arith.maximumf %119, %121 : vector<8x256xf32>
    %c6_i32 = arith.constant 6 : i32
    %123 = tpu.dynamic_rotate %122 by %c6_i32 dim 1 : vector<8x256xf32>, i32 -> vector<8x256xf32>
    %c6_i32_57 = arith.constant 6 : i32
    %124 = vector.broadcast %c6_i32_57 : i32 to vector<8x256xi32>
    %125 = arith.cmpi sge, %16, %124 : vector<8x256xi32>
    %cst_58 = arith.constant 0.000000e+00 : f32
    %126 = vector.broadcast %cst_58 : f32 to vector<8x256xf32>
    %127 = arith.select %125, %123, %126 : vector<8x256xi1>, vector<8x256xf32>
    %c3_i32_59 = arith.constant 3 : i32
    %128 = tpu.dynamic_rotate %122 by %c3_i32_59 dim 1 : vector<8x256xf32>, i32 -> vector<8x256xf32>
    %c3_i32_60 = arith.constant 3 : i32
    %129 = vector.broadcast %c3_i32_60 : i32 to vector<8x256xi32>
    %130 = arith.cmpi sge, %16, %129 : vector<8x256xi32>
    %cst_61 = arith.constant 0.000000e+00 : f32
    %131 = vector.broadcast %cst_61 : f32 to vector<8x256xf32>
    %132 = arith.select %130, %128, %131 : vector<8x256xi1>, vector<8x256xf32>
    %c253_i32_62 = arith.constant 253 : i32
    %133 = tpu.dynamic_rotate %122 by %c253_i32_62 dim 1 : vector<8x256xf32>, i32 -> vector<8x256xf32>
    %c125_i32_63 = arith.constant 125 : i32
    %134 = vector.broadcast %c125_i32_63 : i32 to vector<8x256xi32>
    %135 = arith.cmpi slt, %16, %134 : vector<8x256xi32>
    %cst_64 = arith.constant 0.000000e+00 : f32
    %136 = vector.broadcast %cst_64 : f32 to vector<8x256xf32>
    %137 = arith.select %135, %133, %136 : vector<8x256xi1>, vector<8x256xf32>
    %c250_i32 = arith.constant 250 : i32
    %138 = tpu.dynamic_rotate %122 by %c250_i32 dim 1 : vector<8x256xf32>, i32 -> vector<8x256xf32>
    %c122_i32 = arith.constant 122 : i32
    %139 = vector.broadcast %c122_i32 : i32 to vector<8x256xi32>
    %140 = arith.cmpi slt, %16, %139 : vector<8x256xi32>
    %cst_65 = arith.constant 0.000000e+00 : f32
    %141 = vector.broadcast %cst_65 : f32 to vector<8x256xf32>
    %142 = arith.select %140, %138, %141 : vector<8x256xi1>, vector<8x256xf32>
    %143 = tpu.concatenate %127, %132, %122, %137, %142, %17, %92 in 0 : vector<8x256xf32>, vector<8x256xf32>, vector<8x256xf32>, vector<8x256xf32>, vector<8x256xf32>, vector<1x256xf32>, vector<7x256xf32> -> vector<48x256xf32>
    %c5 = arith.constant 5 : index
    %c0_66 = arith.constant 0 : index
    %c0_67 = arith.constant 0 : index
    %144 = vector.load %arg2[%c5, %c0_66, %c0_67] : memref<8x8x48xf32, #tpu.memory_space<vmem>>, vector<1x8x48xf32>
    %145 = vector.shape_cast %144 : vector<1x8x48xf32> to vector<8x48xf32>
    %cst_68 = arith.constant dense<0.000000e+00> : vector<8x256xf32>
    %146 = tpu.matmul %145, %143, %cst_68 {dimension_numbers = #tpu.dot_dimension_numbers<[1], [0], [0], [1], [0, 0, 1, 1], [], []>} : vector<8x48xf32>, vector<48x256xf32>, vector<8x256xf32> -> vector<8x256xf32>
    %147 = arith.addf %18, %146 : vector<8x256xf32>
    %cst_69 = arith.constant 2.000000e-01 : f32
    %148 = vector.broadcast %cst_69 : f32 to vector<8x256xf32>
    %149 = arith.mulf %148, %147 : vector<8x256xf32>
    %150 = arith.maximumf %147, %149 : vector<8x256xf32>
    %c2_i32_70 = arith.constant 2 : i32
    %151 = tpu.dynamic_rotate %150 by %c2_i32_70 dim 1 : vector<8x256xf32>, i32 -> vector<8x256xf32>
    %c2_i32_71 = arith.constant 2 : i32
    %152 = vector.broadcast %c2_i32_71 : i32 to vector<8x256xi32>
    %153 = arith.cmpi sge, %16, %152 : vector<8x256xi32>
    %cst_72 = arith.constant 0.000000e+00 : f32
    %154 = vector.broadcast %cst_72 : f32 to vector<8x256xf32>
    %155 = arith.select %153, %151, %154 : vector<8x256xi1>, vector<8x256xf32>
    %c1_i32_73 = arith.constant 1 : i32
    %156 = tpu.dynamic_rotate %150 by %c1_i32_73 dim 1 : vector<8x256xf32>, i32 -> vector<8x256xf32>
    %c1_i32_74 = arith.constant 1 : i32
    %157 = vector.broadcast %c1_i32_74 : i32 to vector<8x256xi32>
    %158 = arith.cmpi sge, %16, %157 : vector<8x256xi32>
    %cst_75 = arith.constant 0.000000e+00 : f32
    %159 = vector.broadcast %cst_75 : f32 to vector<8x256xf32>
    %160 = arith.select %158, %156, %159 : vector<8x256xi1>, vector<8x256xf32>
    %c255_i32_76 = arith.constant 255 : i32
    %161 = tpu.dynamic_rotate %150 by %c255_i32_76 dim 1 : vector<8x256xf32>, i32 -> vector<8x256xf32>
    %c127_i32_77 = arith.constant 127 : i32
    %162 = vector.broadcast %c127_i32_77 : i32 to vector<8x256xi32>
    %163 = arith.cmpi slt, %16, %162 : vector<8x256xi32>
    %cst_78 = arith.constant 0.000000e+00 : f32
    %164 = vector.broadcast %cst_78 : f32 to vector<8x256xf32>
    %165 = arith.select %163, %161, %164 : vector<8x256xi1>, vector<8x256xf32>
    %c254_i32_79 = arith.constant 254 : i32
    %166 = tpu.dynamic_rotate %150 by %c254_i32_79 dim 1 : vector<8x256xf32>, i32 -> vector<8x256xf32>
    %c126_i32_80 = arith.constant 126 : i32
    %167 = vector.broadcast %c126_i32_80 : i32 to vector<8x256xi32>
    %168 = arith.cmpi slt, %16, %167 : vector<8x256xi32>
    %cst_81 = arith.constant 0.000000e+00 : f32
    %169 = vector.broadcast %cst_81 : f32 to vector<8x256xf32>
    %170 = arith.select %168, %166, %169 : vector<8x256xi1>, vector<8x256xf32>
    %171 = tpu.concatenate %155, %160, %150, %165, %170, %17, %92 in 0 : vector<8x256xf32>, vector<8x256xf32>, vector<8x256xf32>, vector<8x256xf32>, vector<8x256xf32>, vector<1x256xf32>, vector<7x256xf32> -> vector<48x256xf32>
    %c6 = arith.constant 6 : index
    %c0_82 = arith.constant 0 : index
    %c0_83 = arith.constant 0 : index
    %172 = vector.load %arg2[%c6, %c0_82, %c0_83] : memref<8x8x48xf32, #tpu.memory_space<vmem>>, vector<1x8x48xf32>
    %173 = vector.shape_cast %172 : vector<1x8x48xf32> to vector<8x48xf32>
    %cst_84 = arith.constant dense<0.000000e+00> : vector<8x256xf32>
    %174 = tpu.matmul %173, %171, %cst_84 {dimension_numbers = #tpu.dot_dimension_numbers<[1], [0], [0], [1], [0, 0, 1, 1], [], []>} : vector<8x48xf32>, vector<48x256xf32>, vector<8x256xf32> -> vector<8x256xf32>
    %cst_85 = arith.constant 2.000000e-01 : f32
    %175 = vector.broadcast %cst_85 : f32 to vector<8x256xf32>
    %176 = arith.mulf %175, %174 : vector<8x256xf32>
    %177 = arith.maximumf %174, %176 : vector<8x256xf32>
    %c6_i32_86 = arith.constant 6 : i32
    %178 = tpu.dynamic_rotate %177 by %c6_i32_86 dim 1 : vector<8x256xf32>, i32 -> vector<8x256xf32>
    %c6_i32_87 = arith.constant 6 : i32
    %179 = vector.broadcast %c6_i32_87 : i32 to vector<8x256xi32>
    %180 = arith.cmpi sge, %16, %179 : vector<8x256xi32>
    %cst_88 = arith.constant 0.000000e+00 : f32
    %181 = vector.broadcast %cst_88 : f32 to vector<8x256xf32>
    %182 = arith.select %180, %178, %181 : vector<8x256xi1>, vector<8x256xf32>
    %c3_i32_89 = arith.constant 3 : i32
    %183 = tpu.dynamic_rotate %177 by %c3_i32_89 dim 1 : vector<8x256xf32>, i32 -> vector<8x256xf32>
    %c3_i32_90 = arith.constant 3 : i32
    %184 = vector.broadcast %c3_i32_90 : i32 to vector<8x256xi32>
    %185 = arith.cmpi sge, %16, %184 : vector<8x256xi32>
    %cst_91 = arith.constant 0.000000e+00 : f32
    %186 = vector.broadcast %cst_91 : f32 to vector<8x256xf32>
    %187 = arith.select %185, %183, %186 : vector<8x256xi1>, vector<8x256xf32>
    %c253_i32_92 = arith.constant 253 : i32
    %188 = tpu.dynamic_rotate %177 by %c253_i32_92 dim 1 : vector<8x256xf32>, i32 -> vector<8x256xf32>
    %c125_i32_93 = arith.constant 125 : i32
    %189 = vector.broadcast %c125_i32_93 : i32 to vector<8x256xi32>
    %190 = arith.cmpi slt, %16, %189 : vector<8x256xi32>
    %cst_94 = arith.constant 0.000000e+00 : f32
    %191 = vector.broadcast %cst_94 : f32 to vector<8x256xf32>
    %192 = arith.select %190, %188, %191 : vector<8x256xi1>, vector<8x256xf32>
    %c250_i32_95 = arith.constant 250 : i32
    %193 = tpu.dynamic_rotate %177 by %c250_i32_95 dim 1 : vector<8x256xf32>, i32 -> vector<8x256xf32>
    %c122_i32_96 = arith.constant 122 : i32
    %194 = vector.broadcast %c122_i32_96 : i32 to vector<8x256xi32>
    %195 = arith.cmpi slt, %16, %194 : vector<8x256xi32>
    %cst_97 = arith.constant 0.000000e+00 : f32
    %196 = vector.broadcast %cst_97 : f32 to vector<8x256xf32>
    %197 = arith.select %195, %193, %196 : vector<8x256xi1>, vector<8x256xf32>
    %198 = tpu.concatenate %182, %187, %177, %192, %197, %17, %92 in 0 : vector<8x256xf32>, vector<8x256xf32>, vector<8x256xf32>, vector<8x256xf32>, vector<8x256xf32>, vector<1x256xf32>, vector<7x256xf32> -> vector<48x256xf32>
    %c7 = arith.constant 7 : index
    %c0_98 = arith.constant 0 : index
    %c0_99 = arith.constant 0 : index
    %199 = vector.load %arg2[%c7, %c0_98, %c0_99] : memref<8x8x48xf32, #tpu.memory_space<vmem>>, vector<1x8x48xf32>
    %200 = vector.shape_cast %199 : vector<1x8x48xf32> to vector<8x48xf32>
    %cst_100 = arith.constant dense<0.000000e+00> : vector<8x256xf32>
    %201 = tpu.matmul %200, %198, %cst_100 {dimension_numbers = #tpu.dot_dimension_numbers<[1], [0], [0], [1], [0, 0, 1, 1], [], []>} : vector<8x48xf32>, vector<48x256xf32>, vector<8x256xf32> -> vector<8x256xf32>
    %202 = arith.addf %147, %201 : vector<8x256xf32>
    %203 = arith.addf %91, %202 : vector<8x256xf32>
    %c0_101 = arith.constant 0 : index
    %c0_102 = arith.constant 0 : index
    %204 = vector.load %arg3[%c0_101, %c0_102] : memref<8x256xf32, #tpu.memory_space<vmem>>, vector<8x256xf32>
    tpu.vector_store %arg3[%c0_101, %c0_102], %203 {strides = array<i32>} : memref<8x256xf32, #tpu.memory_space<vmem>>, vector<8x256xf32>,
    return
  }
  func.func @transform_0(%arg0: i32) -> (i32, i32) {
    %c0_i32 = arith.constant 0 : i32
    %c0_i32_0 = arith.constant 0 : i32
    %c0_i32_1 = arith.constant 0 : i32
    return %c0_i32, %c0_i32_0 : i32, i32
  }
  func.func @transform_1(%arg0: i32) -> (i32, i32, i32) {
    %c0_i32 = arith.constant 0 : i32
    %c0_i32_0 = arith.constant 0 : i32
    %c0_i32_1 = arith.constant 0 : i32
    %c0_i32_2 = arith.constant 0 : i32
    return %c0_i32, %c0_i32_0, %c0_i32_1 : i32, i32, i32
  }
  func.func @transform_2(%arg0: i32) -> (i32, i32) {
    %c0_i32 = arith.constant 0 : i32
    %c0_i32_0 = arith.constant 0 : i32
    %c0_i32_1 = arith.constant 0 : i32
    return %c0_i32, %c0_i32_0 : i32, i32
  }
}

</mosaic_0001>

<bundles_post_ra>
// kernel: tpu_custom_call.1
= control target key start
LH: loop header
LB: loop body
LE: loop exit
PB: predicated region body
PF: predicated region fallthrough
CT: control target
= control target key end

     0   :  { %7 = vsyncpa [#allocation3], 0  ;;  %s1858_s0 = inlined_call_operand.hbm [shape: f32[8,256], index: 0, kind: input, shape index: {}]   ;;  %s1859_s1 = inlined_call_operand.hbm [shape: f32[8,8,48], index: 1, kind: input, shape index: {}]   ;;  %s1860_s2 = inlined_call_operand.hbm [shape: f32[8,256], index: 2, kind: output, shape index: {}]  }
   0x1   :  { %8 = vsyncpa [#allocation6], 0 }
   0x2   :  { %9 = vsyncpa [#allocation4], 0  ;;  %s1331_s9 = smov [#allocation2]   ;;  %s1332_s11 = smov [#allocation5]  }
   0x3   :  { %s16_s10 = sshll.u32 %s1331_s9, 4  ;;  %s25_s12 = sshll.u32 %s1332_s11, 4  ;;  %s17_s10 = int_to_ptr.vmem [resolvable:$true] %s16_s10  ;;  %s1362_s12 = int_to_ptr.vmem [resolvable:$true] %s25_s12 }
   0x4   :  { %s1259_s15 = scalar_lea.hbm %s1858_s0, 256 }
   0x5   :  { %p1260_p0 = scmp.ne.s32.totalorder %s1858_s0, %s1259_s15  ;;  %p1263_p1 = scmp.lt.u32.totalorder %s1259_s15, %s1858_s0 }
   0x7   :  { %p1265_p2 = pnand %p1263_p1, %p1260_p0 }
   0x9   :  { %1268 = shalt.err (!%p1265_p2)
}
   0xa   :  { %s1269_s20 = scalar_lea.vmem %s17_s10, 256  ;;  %p1274_p4 = scmp.lt.s32.totalorder %s17_s10, %s17_s10 }
   0xb   :  { %p1270_p3 = scmp.ne.s32.totalorder %s17_s10, %s1269_s20  ;;  %p1275_p5 = scmp.lt.s32.totalorder %s1269_s20, %s1269_s20 }
   0xd   :  { %p1276_p6 = por %p1275_p5, %p1274_p4 }
   0xf   :  { %p1277_p7 = pnand %p1276_p6, %p1270_p3 }
  0x11   :  { %1280 = shalt.err (!%p1277_p7)
}
  0x12   :  { %19 = dma.hbm_to_vmem [thread:$0]  %s1858_s0, 256, %s17_s10, [#allocation3]  }
  0x13   :  { %s1281_s25 = scalar_lea.hbm %s1859_s1, 1024 }
  0x14   :  { %p1282_p8 = scmp.ne.s32.totalorder %s1859_s1, %s1281_s25  ;;  %p1285_p9 = scmp.lt.u32.totalorder %s1281_s25, %s1859_s1 }
  0x16   :  { %p1287_p10 = pnand %p1285_p9, %p1282_p8 }
  0x18   :  { %1290 = shalt.err (!%p1287_p10)
}
  0x19   :  { %s1291_s30 = scalar_lea.vmem %s1362_s12, 1024  ;;  %p1296_p12 = scmp.lt.s32.totalorder %s1362_s12, %s1362_s12 }
  0x1a   :  { %p1292_p11 = scmp.ne.s32.totalorder %s1362_s12, %s1291_s30  ;;  %p1297_p13 = scmp.lt.s32.totalorder %s1291_s30, %s1291_s30 }
  0x1c   :  { %p1298_p0 = por %p1297_p13, %p1296_p12 }
  0x1e   :  { %p1299_p1 = pnand %p1298_p0, %p1292_p11 }
  0x20   :  { %1302 = shalt.err (!%p1299_p1)
}
  0x21   :  { %s1333_s0 = smov 128   ;;  %s1334_s3 = smov 8  }
  0x22   :  { %31 = dma.hbm_to_vmem [thread:$0]  %s1859_s1, 1024, %s1362_s12, [#allocation6], %s1333_s0, %s1333_s0, %s1334_s3  }
  0x23   :  { %1325 = dma.done.wait [#allocation3], 256  }
  0x24   :  { %1326 = vsyncadd [#allocation3], 4294967040 }
  0x25   :  { %1327 = dma.done.wait [#allocation6], 1024  }
  0x26   :  { %1328 = vsyncadd [#allocation6], 4294966272  ;;  %v1393_v0 = vld [vmem:[#allocation2] sm:$0xff]  ;;  %v1395_v1 = vld [vmem:[#allocation2 + $0x8] sm:$0xff]  ;;  %v1335_v7 = vmov 0.0   ;;  %s1336_s1 = smov 1   ;;  %v38_v8 = vlaneseq }
  0x27   :  { %v67_v2 = vmul.f32 0.2, %v1393_v0  ;;  %v68_v3 = vmul.f32 0.2, %v1395_v1  ;;  %164 = vmatprep.mubr.f32.mxu0 %v1335_v7  ;;  %266 = vmatprep.mubr.f32.mxu1 %v1335_v7  ;;  %s1337_s6 = smov 127   ;;  %vm1338_vm4 = vmmov 1  }
  0x28   :  { %v1415_v9 = vand.u32 127, %v38_v8  ;;  %vm1869_vm8 = vcmask 1040384   ;;  %v1339_v27 = vmov 1.0   ;;  %v95_v31 = vld [vmem:[#allocation5] sm:$0xff]  ;;  %vm1874_vm11 = vcmask 392192   ;;  %s1340_s7 = smov 3  }
  0x29   :  { %v1400_v4 = vmax.f32 %v1393_v0, %v67_v2  ;;  %v1403_v5 = vmax.f32 %v1395_v1, %v68_v3  ;;  %s1341_s8 = smov 125   ;;  %v198_v57 = vld [vmem:[#allocation5 + $0x8] sm:$0xff]  ;;  %s1342_s9 = smov 2   ;;  %v296_v26 = vld [vmem:[#allocation5 + $0x10] sm:$0xff] }
  0x2a   :  { %v40_v10 = vadd.s32 128, %v1415_v9  ;;  %vm1868_vm0 = vcmp.lt.s32.totalorder %v1415_v9, 1  ;;  %vm1862_vm2 = vcmp.ge.s32.totalorder %v1415_v9, 1  ;;  %vm1870_vm3 = vcmp.lt.s32.totalorder %v1415_v9, 127  ;;  %s1343_s10 = smov 126   ;;  %s1344_s11 = smov 6  }
  0x2b   :  { %v1407_v6 = vpack.i.bf16 %v1403_v5, %v1400_v4  ;;  %vm1446_vm6 = vmpackc.low %vm1338_vm4, %vm1862_vm2  ;;  %vm1865_vm12 = vcmp.lt.s32.totalorder %v1415_v9, 3  ;;  %vm1864_vm14 = vcmp.ge.s32.totalorder %v1415_v9, 3  ;;  %s1345_s12 = smov 122   ;;  %s1346_s13 = smov [#allocation7]  }
  0x2c   :  { %v1418_v11 = vand.u32 127, %v40_v10  ;;  %vm1477_vm10 = vmpackc.low %vm1869_vm8, %vm1870_vm3  ;;  %s925_s14 = sshll.u32 %s1346_s13, 4  ;;  %s926_s14 = int_to_ptr.vmem [resolvable:$true] %s925_s14 }
  0x2d   :  { %1150 = vrot.lane.b32.xlu0 %v1407_v6, %s1336_s1  ;;  %vm1507_vm2 = vmpackc.low %vm1338_vm4, %vm1864_vm14  ;;  %s1303_s15 = scalar_lea.vmem %s926_s14, 256  ;;  %p1308_p3 = scmp.lt.s32.totalorder %s926_s14, %s926_s14 }
  0x2e   :  { %vm79_vm1 = vcmp.ge.s32.totalorder %v1418_v11, 1  ;;  %vm1861_vm7 = vcmp.lt.s32.totalorder %v1418_v11, 127  ;;  %vm1863_vm13 = vcmp.ge.s32.totalorder %v1418_v11, 3  ;;  %p1304_p2 = scmp.ne.s32.totalorder %s926_s14, %s1303_s15  ;;  %p1309_p4 = scmp.lt.s32.totalorder %s1303_s15, %s1303_s15 }
  0x2f   :  { %vm1431_vm5 = vmpackc.low %vm1338_vm4, %vm79_vm1 }
  0x30   :  { %vm1466_vm9 = vmpackc.low %vm1869_vm8, %vm1861_vm7  ;;  %vm1867_vm7 = vcmp.lt.s32.totalorder %v1415_v9, 125  ;;  %p1310_p5 = por %p1309_p4, %p1308_p3 }
  0x31   :  { %1155 = vrot.lane.b32.xlu0 %v1407_v6, %s1337_s6  ;;  %vm1497_vm15 = vmpackc.low %vm1338_vm4, %vm1863_vm13  ;;  %vm1866_vm13 = vcmp.lt.s32.totalorder %v1418_v11, 125 }
  0x32   :  { %vm1523_vm14 = vmpackc.low %vm1869_vm8, %vm1866_vm13  ;;  %vm1871_vm13 = vcmp.lt.s32.totalorder %v1415_v9, 2  ;;  %p1311_p6 = pnand %p1310_p5, %p1304_p2 }
  0x9f   :  { %v1151_v12 = vpop.permute.xlu0 %1150 }
  0xa0   :  { %v1153_v13 = vunpack.i.h.bf16 %v1151_v12  ;;  %v1152_v14 = vunpack.i.l.bf16 %v1151_v12 }
  0xa2   :  { %v1426_v15 = vsel %vm1868_vm0, %v1152_v14, %v1153_v13  ;;  %v1437_v17 = vsel %vm1868_vm0, %v1153_v13, %v1152_v14 }
  0xa3   :  { %v1156_v18 = vpop.permute.xlu0 %1155  ;;  %v1007_v19 = vpack.c.bf16 %v1403_v5, %v1426_v15  ;;  %v1010_v20 = vpack.c.bf16 %v1400_v4, %v1437_v17 }
  0xa4   :  { %v1158_v22 = vunpack.i.h.bf16 %v1156_v18  ;;  %v1157_v23 = vunpack.i.l.bf16 %v1156_v18 }
  0xa5   :  { %1009 = vmatprep.subr.msk.bf16.mxu0 %vm1431_vm5, %v1007_v19 }
  0xa6   :  { %v1455_v24 = vsel %vm1870_vm3, %v1157_v23, %v1158_v22  ;;  %v1459_v25 = vsel %vm1870_vm3, %v1158_v22, %v1157_v23  ;;  %1012 = vmatpush1.bf16.msk.msra.mxu0 %vm1446_vm6, %v1010_v20 }
  0xa7   :  { %v1013_v28 = vpack.c.bf16 %v1339_v27, %v1459_v25  ;;  %v1016_v29 = vpack.c.bf16 %v1339_v27, %v1455_v24 }
  0xa9   :  { %1015 = vmatprep.subr.msk.bf16.mxu0 %vm1466_vm9, %v1013_v28 }
  0xaa   :  { %1018 = vmatpush1.bf16.msk.msra.mxu0 %vm1477_vm10, %v1016_v29 }
  0xad   :  { %941 = vmatmul.mubr.msk.f32.vlgmr.msra.gmra.mrb[0].mxu0 %vm1874_vm11, %v95_v31 }
  0xae   :  { %364 = vmatprep.mubr.f32.mxu0 %v1335_v7 }
 0x180   :  { %v166_v32 = vpop.f32.mrb[0].mxu0 }
 0x181   :  { %v171_v33 = vmul.f32 0.2, %v166_v32  ;;  %v168_v34 = vpop.f32.mrb[1].mxu0 }
 0x182   :  { %v172_v35 = vmul.f32 0.2, %v168_v34 }
 0x183   :  { %v173_v36 = vmax.f32 %v166_v32, %v171_v33 }
 0x184   :  { %v174_v37 = vmax.f32 %v168_v34, %v172_v35 }
 0x186   :  { %v1159_v38 = vpack.i.bf16 %v174_v37, %v173_v36 }
 0x188   :  { %1160 = vrot.lane.b32.xlu1 %v1159_v38, %s1340_s7 }
 0x18c   :  { %1165 = vrot.lane.b32.xlu1 %v1159_v38, %s1341_s8 }
 0x1fa   :  { %v1161_v39 = vpop.permute.xlu1 %1160 }
 0x1fb   :  { %v1163_v40 = vunpack.i.h.bf16 %v1161_v39  ;;  %v1162_v41 = vunpack.i.l.bf16 %v1161_v39 }
 0x1fd   :  { %v180_v42 = vsel %vm1865_vm12, %v1162_v41, %v1163_v40  ;;  %v181_v44 = vsel %vm1865_vm12, %v1163_v40, %v1162_v41  ;;  %vm1532_vm12 = vmpackc.low %vm1869_vm8, %vm1867_vm7  ;;  %vm478_vm8 = vcmp.ge.s32.totalorder %v1415_v9, 2  ;;  %v726_v41 = vld [vmem:[#allocation5 + $0x30] sm:$0xff] }
 0x1fe   :  { %v1166_v45 = vpop.permute.xlu1 %1165  ;;  %v1019_v46 = vpack.c.bf16 %v174_v37, %v180_v42  ;;  %v1022_v47 = vpack.c.bf16 %v173_v36, %v181_v44  ;;  %v1061_v44 = vpack.c.bf16 %v1459_v25, %v1403_v5  ;;  %v1064_v25 = vpack.c.bf16 %v1455_v24, %v1400_v4  ;;  %v494_v4 = vld [vmem:[#allocation5 + $0x20] sm:$0xff] }
 0x1ff   :  { %v1168_v49 = vunpack.i.h.bf16 %v1166_v45  ;;  %v1167_v50 = vunpack.i.l.bf16 %v1166_v45 }
 0x200   :  { %1021 = vmatprep.subr.msk.bf16.mxu1 %vm1497_vm15, %v1019_v46 }
 0x201   :  { %v191_v51 = vsel %vm1867_vm7, %v1167_v50, %v1168_v49  ;;  %v192_v52 = vsel %vm1867_vm7, %v1168_v49, %v1167_v50  ;;  %1024 = vmatpush1.bf16.msk.msra.mxu1 %vm1507_vm2, %v1022_v47  ;;  %vm479_vm7 = vcmp.ge.s32.totalorder %v1418_v11, 2 }
 0x202   :  { %v1025_v54 = vpack.c.bf16 %v1339_v27, %v192_v52  ;;  %v1028_v55 = vpack.c.bf16 %v1339_v27, %v191_v51 }
 0x204   :  { %1027 = vmatprep.subr.msk.bf16.mxu1 %vm1523_vm14, %v1025_v54 }
 0x205   :  { %1030 = vmatpush1.bf16.msk.msra.mxu1 %vm1532_vm12, %v1028_v55 }
 0x208   :  { %948 = vmatmul.mubr.msk.f32.vlgmr.msra.gmra.mrb[0].mxu1 %vm1874_vm11, %v198_v57 }
 0x209   :  { %460 = vmatprep.mubr.f32.mxu1 %v1335_v7 }
 0x2db   :  { %v268_v58 = vpop.f32.mrb[0].mxu1 }
 0x2dc   :  { %v1543_v59 = vadd.f32 %v268_v58, %v1393_v0  ;;  %v270_v60 = vpop.f32.mrb[1].mxu1 }
 0x2dd   :  { %v1546_v61 = vadd.f32 %v270_v60, %v1395_v1 }
 0x2de   :  { %v275_v62 = vmul.f32 0.2, %v1543_v59 }
 0x2df   :  { %v276_v63 = vmul.f32 0.2, %v1546_v61 }
 0x2e0   :  { %v277_v2 = vmax.f32 %v1543_v59, %v275_v62 }
 0x2e1   :  { %v278_v3 = vmax.f32 %v1546_v61, %v276_v63 }
 0x2e3   :  { %v1174_v8 = vpack.i.bf16 %v278_v3, %v277_v2 }
 0x2e5   :  { %1175 = vrot.lane.b32.xlu1 %v1174_v8, %s1337_s6  ;;  %1170 = vrot.lane.b32.xlu0 %v1174_v8, %s1336_s1 }
 0x2e9   :  { %1180 = vrot.lane.b32.xlu0 %v1407_v6, %s1342_s9  ;;  %1185 = vrot.lane.b32.xlu1 %v1407_v6, %s1343_s10 }
 0x357   :  { %v1176_v10 = vpop.permute.xlu1 %1175  ;;  %v1171_v12 = vpop.permute.xlu0 %1170 }
 0x358   :  { %v1178_v13 = vunpack.i.h.bf16 %v1176_v10  ;;  %v1177_v14 = vunpack.i.l.bf16 %v1176_v10  ;;  %v1173_v18 = vunpack.i.h.bf16 %v1171_v12  ;;  %v1172_v19 = vunpack.i.l.bf16 %v1171_v12 }
 0x35a   :  { %v292_v20 = vsel %vm1870_vm3, %v1178_v13, %v1177_v14  ;;  %v283_v22 = vsel %vm1868_vm0, %v1172_v19, %v1173_v18  ;;  %v284_v23 = vsel %vm1868_vm0, %v1173_v18, %v1172_v19  ;;  %v291_v33 = vsel %vm1870_vm3, %v1177_v14, %v1178_v13  ;;  %vm1579_vm0 = vmpackc.low %vm79_vm1, %vm479_vm7 }
 0x35b   :  { %v1031_v28 = vpack.c.bf16 %v278_v3, %v283_v22  ;;  %v1034_v29 = vpack.c.bf16 %v277_v2, %v284_v23  ;;  %v1181_v6 = vpop.permute.xlu0 %1180  ;;  %v1037_v34 = vpack.c.bf16 %v1339_v27, %v292_v20  ;;  %v1186_v35 = vpop.permute.xlu1 %1185  ;;  %v1040_v16 = vpack.c.bf16 %v1339_v27, %v291_v33  ;;  %v392_v33 = vld [vmem:[#allocation5 + $0x18] sm:$0xff] }
 0x35c   :  { %v1183_v31 = vunpack.i.h.bf16 %v1181_v6  ;;  %v1182_v32 = vunpack.i.l.bf16 %v1181_v6  ;;  %v1188_v38 = vunpack.i.h.bf16 %v1186_v35  ;;  %v1187_v39 = vunpack.i.l.bf16 %v1186_v35 }
 0x35d   :  { %1033 = vmatprep.subr.msk.bf16.mxu0 %vm1431_vm5, %v1031_v28  ;;  %vm1872_vm5 = vcmp.lt.s32.totalorder %v1415_v9, 126  ;;  %vm1894_vm1 = vcmp.ge.s32.totalorder %v1415_v9, 1  ;;  %vm1897_vm7 = vcmp.lt.s32.totalorder %v1418_v11, 127 }
 0x35e   :  { %v476_v36 = vsel %vm1871_vm13, %v1182_v32, %v1183_v31  ;;  %1036 = vmatpush1.bf16.msk.msra.mxu0 %vm1446_vm6, %v1034_v29  ;;  %v477_v40 = vsel %vm1871_vm13, %v1183_v31, %v1182_v32  ;;  %vm1593_vm6 = vmpackc.low %vm1894_vm1, %vm478_vm8  ;;  %vm490_vm8 = vcmp.lt.s32.totalorder %v1418_v11, 126  ;;  %vm1902_vm1 = vcmask 1040384  }
 0x35f   :  { %1039 = vmatprep.subr.msk.bf16.mxu0 %vm1466_vm9, %v1037_v34  ;;  %v1055_v21 = vpack.c.bf16 %v1426_v15, %v476_v36  ;;  %v1058_v42 = vpack.c.bf16 %v1437_v17, %v477_v40  ;;  %v488_v15 = vsel %vm1872_vm5, %v1188_v38, %v1187_v39  ;;  %vm1605_vm9 = vmpackc.low %vm1897_vm7, %vm1338_vm4  ;;  %v487_v17 = vsel %vm1872_vm5, %v1187_v39, %v1188_v38 }
 0x360   :  { %v1067_v45 = vpack.c.bf16 %v1339_v27, %v488_v15  ;;  %vm1631_vm7 = vmpackc.low %vm1902_vm1, %vm490_vm8  ;;  %v1070_v47 = vpack.c.bf16 %v1339_v27, %v487_v17  ;;  %vm1909_vm8 = vcmp.lt.s32.totalorder %v1415_v9, 3 }
 0x362   :  { %1042 = vmatpush1.bf16.msk.msra.mxu0 %vm1477_vm10, %v1040_v16  ;;  %vm1624_vm10 = vmpackc.low %vm1870_vm3, %vm1338_vm4 }
 0x363   :  { %1057 = vmatprep.subr.msk.bf16.mxu0 %vm1579_vm0, %v1055_v21  ;;  %vm1905_vm3 = vmmov %vm1902_vm1  ;;  %v838_v21 = vld [vmem:[#allocation5 + $0x38] sm:$0xff] }
 0x364   :  { %vm1643_vm13 = vmpackc.low %vm1905_vm3, %vm1872_vm5  ;;  %vm1908_vm3 = vcmp.lt.s32.totalorder %v1415_v9, 125 }
 0x365   :  { %955 = vmatmul.mubr.msk.f32.vlgmr.msra.gmra.mrb[2].mxu0 %vm1874_vm11, %v296_v26  ;;  %vm1910_vm1 = vmmov %vm1909_vm8 }
 0x366   :  { %1060 = vmatpush1.bf16.msk.msra.mxu0 %vm1593_vm6, %v1058_v42  ;;  %562 = vmatprep.mubr.f32.mxu0 %v1335_v7  ;;  %vm1911_vm5 = vmmov %vm1908_vm3 }
 0x367   :  { %1063 = vmatprep.subr.msk.bf16.mxu0 %vm1605_vm9, %v1061_v44 }
 0x36a   :  { %1066 = vmatpush1.bf16.msk.msra.mxu0 %vm1624_vm10, %v1064_v25 }
 0x36b   :  { %1069 = vmatprep.subr.msk.bf16.mxu0 %vm1631_vm7, %v1067_v45 }
 0x36e   :  { %1072 = vmatpush1.bf16.msk.msra.mxu0 %vm1643_vm13, %v1070_v47 }
 0x371   :  { %973 = vmatmul.mubr.msk.f32.vlgmr.msra.gmra.mrb[4].mxu0 %vm1874_vm11, %v494_v4 }
 0x372   :  { %794 = vmatprep.mubr.f32.mxu0 %v1335_v7 }
 0x438   :  { %v366_v24 = vpop.f32.mrb[2].mxu0 }
 0x439   :  { %v371_v50 = vmul.f32 0.2, %v366_v24  ;;  %v368_v51 = vpop.f32.mrb[3].mxu0 }
 0x43a   :  { %v372_v52 = vmul.f32 0.2, %v368_v51 }
 0x43b   :  { %v373_v54 = vmax.f32 %v366_v24, %v371_v50 }
 0x43c   :  { %v374_v55 = vmax.f32 %v368_v51, %v372_v52 }
 0x43e   :  { %v1194_v57 = vpack.i.bf16 %v374_v55, %v373_v54 }
 0x440   :  { %1195 = vrot.lane.b32.xlu1 %v1194_v57, %s1341_s8  ;;  %1190 = vrot.lane.b32.xlu0 %v1194_v57, %s1340_s7 }
 0x444   :  { %v564_v58 = vpop.f32.mrb[4].mxu0 }
 0x445   :  { %v569_v60 = vmul.f32 0.2, %v564_v58  ;;  %v566_v62 = vpop.f32.mrb[5].mxu0 }
 0x446   :  { %v570_v63 = vmul.f32 0.2, %v566_v62 }
 0x447   :  { %v1653_v2 = vmax.f32 %v564_v58, %v569_v60 }
 0x448   :  { %v1655_v3 = vmax.f32 %v566_v62, %v570_v63  ;;  %v612_v63 = vld [vmem:[#allocation5 + $0x28] sm:$0xff] }
 0x44a   :  { %v1204_v8 = vpack.i.bf16 %v1655_v3, %v1653_v2 }
 0x44c   :  { %1205 = vrot.lane.b32.xlu1 %v1204_v8, %s1340_s7  ;;  %1200 = vrot.lane.b32.xlu0 %v1204_v8, %s1344_s11 }
 0x450   :  { %1215 = vrot.lane.b32.xlu1 %v1204_v8, %s1345_s12  ;;  %1210 = vrot.lane.b32.xlu0 %v1204_v8, %s1341_s8 }
 0x4b2   :  { %v1196_v10 = vpop.permute.xlu1 %1195  ;;  %v1191_v12 = vpop.permute.xlu0 %1190 }
 0x4b3   :  { %v1198_v13 = vunpack.i.h.bf16 %v1196_v10  ;;  %v1197_v14 = vunpack.i.l.bf16 %v1196_v10  ;;  %v1193_v18 = vunpack.i.h.bf16 %v1191_v12  ;;  %v1192_v19 = vunpack.i.l.bf16 %v1191_v12 }
 0x4b5   :  { %v388_v20 = vsel %vm1908_vm3, %v1198_v13, %v1197_v14  ;;  %v379_v22 = vsel %vm1909_vm8, %v1192_v19, %v1193_v18  ;;  %v380_v23 = vsel %vm1910_vm1, %v1193_v18, %v1192_v19  ;;  %v387_v6 = vsel %vm1911_vm5, %v1197_v14, %v1198_v13 }
 0x4b6   :  { %v1043_v28 = vpack.c.bf16 %v374_v55, %v379_v22  ;;  %v1046_v29 = vpack.c.bf16 %v373_v54, %v380_v23  ;;  %v1049_v31 = vpack.c.bf16 %v1339_v27, %v388_v20  ;;  %v1052_v32 = vpack.c.bf16 %v1339_v27, %v387_v6 }
 0x4b7   :  { %vm581_vm3 = vcmp.ge.s32.totalorder %v1418_v11, 6  ;;  %vm580_vm5 = vcmp.ge.s32.totalorder %v1415_v9, 6  ;;  %vm1873_vm8 = vcmp.lt.s32.totalorder %v1415_v9, 6 }
 0x4b8   :  { %1045 = vmatprep.subr.msk.bf16.mxu1 %vm1497_vm15, %v1043_v28  ;;  %vm1916_vm15 = vmmov %vm1910_vm1 }
 0x4b9   :  { %1048 = vmatpush1.bf16.msk.msra.mxu1 %vm1507_vm2, %v1046_v29  ;;  %vm1912_vm2 = vcmp.ge.s32.totalorder %v1418_v11, 3 }
 0x4ba   :  { %1051 = vmatprep.subr.msk.bf16.mxu1 %vm1523_vm14, %v1049_v31  ;;  %vm1687_vm14 = vmpackc.low %vm1912_vm2, %vm581_vm3  ;;  %vm1875_vm2 = vcmp.lt.s32.totalorder %v1415_v9, 122 }
 0x4bd   :  { %1054 = vmatpush1.bf16.msk.msra.mxu1 %vm1532_vm12, %v1052_v32  ;;  %vm1915_vm12 = vmmov %vm1910_vm1  ;;  %vm1917_vm1 = vcmp.ge.s32.totalorder %v1415_v9, 3 }
 0x4be   :  { %v1206_v34 = vpop.permute.xlu1 %1205  ;;  %v1201_v43 = vpop.permute.xlu0 %1200  ;;  %vm1704_vm3 = vmpackc.low %vm1917_vm1, %vm580_vm5  ;;  %vm1920_vm5 = vcmp.lt.s32.totalorder %v1415_v9, 125  ;;  %vm1922_vm1 = vcmp.lt.s32.totalorder %v1418_v11, 125 }
 0x4bf   :  { %v1208_v35 = vunpack.i.h.bf16 %v1206_v34  ;;  %v1207_v48 = vunpack.i.l.bf16 %v1206_v34  ;;  %v1203_v36 = vunpack.i.h.bf16 %v1201_v43  ;;  %v1202_v16 = vunpack.i.l.bf16 %v1201_v43 }
 0x4c0   :  { %962 = vmatmul.mubr.msk.f32.vlgmr.msra.gmra.mrb[2].mxu1 %vm1874_vm11, %v392_v33  ;;  %vm1732_vm11 = vmpackc.low %vm1920_vm5, %vm1338_vm4 }
 0x4c1   :  { %v588_v56 = vsel %vm1915_vm12, %v1207_v48, %v1208_v35  ;;  %v589_v38 = vsel %vm1916_vm15, %v1208_v35, %v1207_v48  ;;  %v578_v39 = vsel %vm1873_vm8, %v1202_v16, %v1203_v36  ;;  %v579_v40 = vsel %vm1873_vm8, %v1203_v36, %v1202_v16  ;;  %680 = vmatprep.mubr.f32.mxu1 %v1335_v7  ;;  %vm1921_vm15 = vmmov %vm1920_vm5 }
 0x4c2   :  { %v1073_v26 = vpack.c.bf16 %v588_v56, %v578_v39  ;;  %v1076_v42 = vpack.c.bf16 %v589_v38, %v579_v40  ;;  %v1216_v15 = vpop.permute.xlu1 %1215  ;;  %v1211_v44 = vpop.permute.xlu0 %1210  ;;  %vm608_vm12 = vcmp.lt.s32.totalorder %v1418_v11, 122  ;;  %vm1723_vm8 = vmpackc.low %vm1922_vm1, %vm1338_vm4  ;;  %vm1930_vm1 = vcmp.lt.s32.totalorder %v1415_v9, 122 }
 0x4c3   :  { %v1218_v17 = vunpack.i.h.bf16 %v1216_v15  ;;  %v1217_v45 = vunpack.i.l.bf16 %v1216_v15  ;;  %v1213_v25 = vunpack.i.h.bf16 %v1211_v44  ;;  %v1212_v47 = vunpack.i.l.bf16 %v1211_v44  ;;  %vm1931_vm4 = vmmov %vm1930_vm1 }
 0x4c4   :  { %1075 = vmatprep.subr.msk.bf16.mxu1 %vm1687_vm14, %v1073_v26 }
 0x4c5   :  { %v606_v4 = vsel %vm1875_vm2, %v1218_v17, %v1217_v45  ;;  %v596_v24 = vsel %vm1920_vm5, %v1212_v47, %v1213_v25  ;;  %v597_v50 = vsel %vm1921_vm15, %v1213_v25, %v1212_v47  ;;  %1078 = vmatpush1.bf16.msk.msra.mxu1 %vm1704_vm3, %v1076_v42  ;;  %vm1927_vm15 = vcmask 1040384  }
 0x4c6   :  { %v1079_v52 = vpack.c.bf16 %v597_v50, %v1655_v3  ;;  %v1082_v54 = vpack.c.bf16 %v596_v24, %v1653_v2  ;;  %vm1737_vm2 = vmpackc.low %vm1927_vm15, %vm608_vm12  ;;  %v605_v11 = vsel %vm1930_vm1, %v1217_v45, %v1218_v17  ;;  %v1085_v58 = vpack.c.bf16 %v1339_v27, %v606_v4 }
 0x4c7   :  { %vm1932_vm12 = vmmov %vm1927_vm15  ;;  %v1088_v62 = vpack.c.bf16 %v1339_v27, %v605_v11  ;;  %vm1935_vm15 = vcmask 392192   ;;  %vm1936_vm1 = vcmp.lt.s32.totalorder %v1415_v9, 1 }
 0x4c8   :  { %1081 = vmatprep.subr.msk.bf16.mxu1 %vm1723_vm8, %v1079_v52  ;;  %vm1753_vm5 = vmpackc.low %vm1932_vm12, %vm1931_vm4  ;;  %vm1938_vm12 = vcmp.lt.s32.totalorder %v1415_v9, 2 }
 0x4c9   :  { %1084 = vmatpush1.bf16.msk.msra.mxu1 %vm1732_vm11, %v1082_v54  ;;  %vm1937_vm4 = vmmov %vm1936_vm1 }
 0x4ca   :  { %1087 = vmatprep.subr.msk.bf16.mxu1 %vm1737_vm2, %v1085_v58 }
 0x4cd   :  { %1090 = vmatpush1.bf16.msk.msra.mxu1 %vm1753_vm5, %v1088_v62 }
 0x4d0   :  { %984 = vmatmul.mubr.msk.f32.vlgmr.msra.gmra.mrb[4].mxu1 %vm1935_vm15, %v612_v63  ;;  %vm1939_vm15 = vmmov %vm1938_vm12 }
 0x4d1   :  { %906 = vmatprep.mubr.f32.mxu1 %v1335_v7 }
 0x5a3   :  { %v682_v2 = vpop.f32.mrb[4].mxu1 }
 0x5a4   :  { %v1763_v3 = vadd.f32 %v682_v2, %v1393_v0  ;;  %v684_v8 = vpop.f32.mrb[5].mxu1 }
 0x5a5   :  { %v1766_v10 = vadd.f32 %v684_v8, %v1395_v1 }
 0x5a6   :  { %v689_v12 = vmul.f32 0.2, %v1763_v3 }
 0x5a7   :  { %v690_v13 = vmul.f32 0.2, %v1766_v10  ;;  %v1129_v55 = vadd.f32 %v1766_v10, %v1546_v61 }
 0x5a8   :  { %v691_v14 = vmax.f32 %v1763_v3, %v689_v12 }
 0x5a9   :  { %v692_v18 = vmax.f32 %v1766_v10, %v690_v13 }
 0x5ab   :  { %v1224_v19 = vpack.i.bf16 %v692_v18, %v691_v14 }
 0x5ad   :  { %1225 = vrot.lane.b32.xlu1 %v1224_v19, %s1336_s1  ;;  %1220 = vrot.lane.b32.xlu0 %v1224_v19, %s1342_s9 }
 0x5b1   :  { %1235 = vrot.lane.b32.xlu1 %v1224_v19, %s1343_s10  ;;  %1230 = vrot.lane.b32.xlu0 %v1224_v19, %s1337_s6 }
 0x61f   :  { %v1226_v0 = vpop.permute.xlu1 %1225  ;;  %v1221_v1 = vpop.permute.xlu0 %1220 }
 0x620   :  { %v1228_v7 = vunpack.i.h.bf16 %v1226_v0  ;;  %v1227_v20 = vunpack.i.l.bf16 %v1226_v0  ;;  %v1223_v22 = vunpack.i.h.bf16 %v1221_v1  ;;  %v1222_v23 = vunpack.i.l.bf16 %v1221_v1 }
 0x622   :  { %v705_v28 = vsel %vm1936_vm1, %v1227_v20, %v1228_v7  ;;  %v706_v29 = vsel %vm1937_vm4, %v1228_v7, %v1227_v20  ;;  %v697_v6 = vsel %vm1938_vm12, %v1222_v23, %v1223_v22  ;;  %v698_v31 = vsel %vm1939_vm15, %v1223_v22, %v1222_v23 }
 0x623   :  { %v1091_v32 = vpack.c.bf16 %v705_v28, %v697_v6  ;;  %v1094_v33 = vpack.c.bf16 %v706_v29, %v698_v31  ;;  %v1236_v34 = vpop.permute.xlu1 %1235  ;;  %v1231_v43 = vpop.permute.xlu0 %1230  ;;  %vm1940_vm1 = vcmp.lt.s32.totalorder %v1415_v9, 126  ;;  %vm1941_vm4 = vcmp.lt.s32.totalorder %v1415_v9, 127 }
 0x624   :  { %v1238_v35 = vunpack.i.h.bf16 %v1236_v34  ;;  %v1237_v48 = vunpack.i.l.bf16 %v1236_v34  ;;  %v1233_v36 = vunpack.i.h.bf16 %v1231_v43  ;;  %v1232_v16 = vunpack.i.l.bf16 %v1231_v43  ;;  %vm1942_vm12 = vmmov %vm1941_vm4 }
 0x625   :  { %1093 = vmatprep.subr.msk.bf16.mxu0 %vm1579_vm0, %v1091_v32  ;;  %vm1943_vm15 = vmmov %vm1940_vm1  ;;  %vm1944_vm0 = vcmask 392192  }
 0x626   :  { %v722_v56 = vsel %vm1940_vm1, %v1238_v35, %v1237_v48  ;;  %v713_v38 = vsel %vm1941_vm4, %v1232_v16, %v1233_v36  ;;  %v714_v39 = vsel %vm1942_vm12, %v1233_v36, %v1232_v16  ;;  %1096 = vmatpush1.bf16.msk.msra.mxu0 %vm1593_vm6, %v1094_v33  ;;  %v721_v42 = vsel %vm1943_vm15, %v1237_v48, %v1238_v35 }
 0x627   :  { %v1097_v40 = vpack.c.bf16 %v714_v39, %v692_v18  ;;  %v1100_v26 = vpack.c.bf16 %v713_v38, %v691_v14  ;;  %v1103_v37 = vpack.c.bf16 %v1339_v27, %v722_v56  ;;  %v1106_v15 = vpack.c.bf16 %v1339_v27, %v721_v42 }
 0x628   :  { %vm1950_vm1 = vcmp.lt.s32.totalorder %v1415_v9, 125 }
 0x629   :  { %1099 = vmatprep.subr.msk.bf16.mxu0 %vm1605_vm9, %v1097_v40  ;;  %vm1947_vm9 = vcmp.lt.s32.totalorder %v1415_v9, 6  ;;  %vm1951_vm4 = vmmov %vm1950_vm1 }
 0x62a   :  { %1102 = vmatpush1.bf16.msk.msra.mxu0 %vm1624_vm10, %v1100_v26  ;;  %vm1948_vm10 = vmmov %vm1947_vm9 }
 0x62b   :  { %1105 = vmatprep.subr.msk.bf16.mxu0 %vm1631_vm7, %v1103_v37  ;;  %vm1949_vm7 = vcmp.lt.s32.totalorder %v1415_v9, 122 }
 0x62c   :  { %vm1952_vm12 = vmmov %vm1949_vm7 }
 0x62e   :  { %1108 = vmatpush1.bf16.msk.msra.mxu0 %vm1643_vm13, %v1106_v15  ;;  %vm1945_vm13 = vcmp.lt.s32.totalorder %v1415_v9, 3  ;;  %v1127_v9 = vadd.f32 %v1763_v3, %v1543_v59 }
 0x62f   :  { %vm1946_vm6 = vmmov %vm1945_vm13 }
 0x631   :  { %995 = vmatmul.mubr.msk.f32.vlgmr.msra.gmra.mrb[6].mxu0 %vm1944_vm0, %v726_v41 }
 0x704   :  { %v796_v44 = vpop.f32.mrb[6].mxu0 }
 0x705   :  { %v801_v17 = vmul.f32 0.2, %v796_v44  ;;  %v798_v45 = vpop.f32.mrb[7].mxu0 }
 0x706   :  { %v802_v25 = vmul.f32 0.2, %v798_v45 }
 0x707   :  { %v803_v30 = vmax.f32 %v796_v44, %v801_v17 }
 0x708   :  { %v804_v47 = vmax.f32 %v798_v45, %v802_v25 }
 0x70a   :  { %v1244_v4 = vpack.i.bf16 %v804_v47, %v803_v30 }
 0x70c   :  { %1245 = vrot.lane.b32.xlu1 %v1244_v4, %s1340_s7  ;;  %1240 = vrot.lane.b32.xlu0 %v1244_v4, %s1344_s11 }
 0x710   :  { %1255 = vrot.lane.b32.xlu1 %v1244_v4, %s1345_s12  ;;  %1250 = vrot.lane.b32.xlu0 %v1244_v4, %s1341_s8 }
 0x77e   :  { %v1246_v5 = vpop.permute.xlu1 %1245  ;;  %v1241_v46 = vpop.permute.xlu0 %1240 }
 0x77f   :  { %v1248_v49 = vunpack.i.h.bf16 %v1246_v5  ;;  %v1247_v24 = vunpack.i.l.bf16 %v1246_v5  ;;  %v1243_v50 = vunpack.i.h.bf16 %v1241_v46  ;;  %v1242_v52 = vunpack.i.l.bf16 %v1241_v46 }
 0x781   :  { %v817_v54 = vsel %vm1945_vm13, %v1247_v24, %v1248_v49  ;;  %v818_v11 = vsel %vm1946_vm6, %v1248_v49, %v1247_v24  ;;  %v809_v58 = vsel %vm1947_vm9, %v1242_v52, %v1243_v50  ;;  %v810_v62 = vsel %vm1948_vm10, %v1243_v50, %v1242_v52 }
 0x782   :  { %v1109_v63 = vpack.c.bf16 %v817_v54, %v809_v58  ;;  %v1112_v2 = vpack.c.bf16 %v818_v11, %v810_v62  ;;  %v1256_v8 = vpop.permute.xlu1 %1255  ;;  %v1251_v12 = vpop.permute.xlu0 %1250 }
 0x783   :  { %v1258_v13 = vunpack.i.h.bf16 %v1256_v8  ;;  %v1257_v14 = vunpack.i.l.bf16 %v1256_v8  ;;  %v1253_v18 = vunpack.i.h.bf16 %v1251_v12  ;;  %v1252_v19 = vunpack.i.l.bf16 %v1251_v12 }
 0x784   :  { %1111 = vmatprep.subr.msk.bf16.mxu1 %vm1687_vm14, %v1109_v63  ;;  %vm1953_vm14 = vmmov %vm1944_vm0 }
 0x785   :  { %v834_v0 = vsel %vm1949_vm7, %v1258_v13, %v1257_v14  ;;  %v825_v1 = vsel %vm1950_vm1, %v1252_v19, %v1253_v18  ;;  %v826_v7 = vsel %vm1951_vm4, %v1253_v18, %v1252_v19  ;;  %1114 = vmatpush1.bf16.msk.msra.mxu1 %vm1704_vm3, %v1112_v2  ;;  %v833_v23 = vsel %vm1952_vm12, %v1257_v14, %v1258_v13 }
 0x786   :  { %v1115_v20 = vpack.c.bf16 %v826_v7, %v804_v47  ;;  %v1118_v22 = vpack.c.bf16 %v825_v1, %v803_v30  ;;  %v1121_v53 = vpack.c.bf16 %v1339_v27, %v834_v0  ;;  %v1124_v28 = vpack.c.bf16 %v1339_v27, %v833_v23 }
 0x788   :  { %1117 = vmatprep.subr.msk.bf16.mxu1 %vm1723_vm8, %v1115_v20 }
 0x789   :  { %1120 = vmatpush1.bf16.msk.msra.mxu1 %vm1732_vm11, %v1118_v22 }
 0x78a   :  { %1123 = vmatprep.subr.msk.bf16.mxu1 %vm1737_vm2, %v1121_v53 }
 0x78d   :  { %1126 = vmatpush1.bf16.msk.msra.mxu1 %vm1753_vm5, %v1124_v28 }
 0x790   :  { %1006 = vmatmul.mubr.msk.f32.vlgmr.msra.gmra.mrb[2].mxu1 %vm1953_vm14, %v838_v21 }
 0x863   :  { %v908_v51 = vpop.f32.mrb[2].mxu1 }
 0x864   :  { %v1128_v29 = vadd.f32 %v1127_v9, %v908_v51  ;;  %v910_v57 = vpop.f32.mrb[3].mxu1 }
 0x865   :  { %v1130_v6 = vadd.f32 %v1129_v55, %v910_v57 }
 0x866   :  { %917 = vst [vmem:[#allocation7] sm:$0xff] %v1128_v29 }
 0x867   :  { %918 = vst [vmem:[#allocation7 + $0x8] sm:$0xff] %v1130_v6 }
 0x868   :  { %1314 = shalt.err (!%p1311_p6)
}
 0x869   :  { %s1315_s18 = scalar_lea.hbm %s1860_s2, 256 }
 0x86a   :  { %p1316_p7 = scmp.ne.s32.totalorder %s1860_s2, %s1315_s18  ;;  %p1319_p8 = scmp.lt.u32.totalorder %s1315_s18, %s1860_s2 }
 0x86c   :  { %p1321_p9 = pnand %p1319_p8, %p1316_p7 }
 0x86e   :  { %1324 = shalt.err (!%p1321_p9)
}
 0x86f   :  { %928 = dma.vmem_to_hbm [thread:$0]  %s926_s14, 256, %s1860_s2, [#allocation4]  }
 0x870   :  { %1329 = dma.done.wait [#allocation4], 256  }
 0x871   :  { %1330 = vsyncadd [#allocation4], 4294967040 }
 0x872   :  { %932 = vsyncpa [#allocation3], 1 }
 0x873   :  { %933 = vsyncpa [#allocation6], 1 }
 0x874   :  { %934 = vsyncpa [#allocation4], 1 }

</bundles_post_ra>
